<compile_context>
chip_gen: v7x
topology: tpu7x:2x2x1
jax: 0.10.0
libtpu: 0.0.40
codegen_flags: <defaults>
</compile_context>

<pallas_src>
import functools

import jax
import jax.numpy as jnp
from jax.experimental import pallas as pl
from jax.experimental.pallas import tpu as pltpu


def _round_up(v: int, m: int) -> int:
    return (v + m - 1) // m * m


def _decoder_kernel(idx_ref, pt_ref, qt_ref, b1_ref, w2_ref, b2_ref, out_ref,
                    *, n_nodes: int, apply_sigmoid: bool):
    """One edge tile (edge dim in lanes throughout).

    idx_ref: (2, TE) int32  -- src / dst node ids for this tile
    pt_ref : (C, N)  bf16   -- W1[:, :C] @ x.T  (per-node src projection)
    qt_ref : (C, N)  bf16   -- W1[:, C:] @ x.T  (per-node dst projection)
    b1_ref : (C, 1)  f32    w2_ref: (1, C) f32   b2_ref: (1, 1) f32
    out_ref: (1, TE) f32    -- lane-dense output row
    """
    te = out_ref.shape[-1]
    idx = idx_ref[...]                                    # (2, TE)
    src = idx[0:1, :]                                     # (1, TE)
    dst = idx[1:2, :]                                     # (1, TE)

    # Fused gather + linear1: one-hot(src/dst) matmuls against resident P / Q.
    node_iota = jax.lax.broadcasted_iota(jnp.int32, (n_nodes, te), 0)
    oh_src = (node_iota == src).astype(pt_ref.dtype)      # (N, TE)
    oh_dst = (node_iota == dst).astype(qt_ref.dtype)      # (N, TE)
    h = jnp.dot(pt_ref[...], oh_src, preferred_element_type=jnp.float32)
    h = h + jnp.dot(qt_ref[...], oh_dst, preferred_element_type=jnp.float32)
    h = jnp.maximum(h + b1_ref[...], 0.0)                 # (C, TE) f32, ReLU

    # linear2 as (1, C) @ (C, TE) -> lane-dense (1, TE) row (unmasked stores).
    y = jnp.dot(w2_ref[...], h, preferred_element_type=jnp.float32)
    y = y + b2_ref[...]
    if apply_sigmoid:
        y = jax.nn.sigmoid(y)
    out_ref[...] = y.astype(out_ref.dtype)


def _vmem_bytes(tile_e: int, n_nodes: int, c: int) -> int:
    """Lane-padding-aware VMEM footprint estimate (bytes)."""
    sub = lambda v: _round_up(max(v, 1), 8)       # sublane granularity
    lane = lambda v: _round_up(max(v, 1), 128)    # lane granularity
    idx_blk = sub(2) * lane(tile_e) * 4                        # (2, TE) i32
    out_blk = sub(1) * lane(tile_e) * 4                        # (1, TE) f32
    resident = (2 * sub(c) * lane(n_nodes) * 2                 # P, Q bf16
                + sub(c) * lane(1) * 4                         # b1 (C, 1)
                + sub(1) * lane(c) * 4                         # w2 (1, C)
                + sub(1) * lane(1) * 4)                        # b2 (1, 1)
    temps = (2 * sub(n_nodes) * lane(tile_e) * 2               # one-hots bf16
             + sub(c) * lane(tile_e) * 4                       # h f32
             + sub(1) * lane(tile_e) * 4)                      # y row f32
    return 2 * (idx_blk + out_blk + resident) + temps          # x2: double buffer


def decoder_forward(x, edge_index, params, sigmoid=True, tile_e=8192):
    """Replicates Decoder.forward(x, edge_index, sigmoid)."""
    w1, b1, w2, b2 = params          # w1: [C, 2C], b1: [C], w2: [1, C], b2: [1]
    C = int(w1.shape[0])
    N = int(x.shape[0])
    E = int(edge_index.shape[1])

    # --- per-node projections: fold linear1 through the gather (tiny, f32) ---
    w1f = jnp.asarray(w1, jnp.float32)
    xt = jnp.asarray(x, jnp.float32).T                    # (C, N)
    pt = (w1f[:, :C] @ xt).astype(jnp.bfloat16)           # (C, N)
    qt = (w1f[:, C:] @ xt).astype(jnp.bfloat16)           # (C, N)
    b1c = jnp.asarray(b1, jnp.float32).reshape(C, 1)
    w2r = jnp.asarray(w2, jnp.float32).reshape(1, C)
    b2r = jnp.asarray(b2, jnp.float32).reshape(1, 1)

    # --- edge tile: lane-dense, >=2 tiles when possible (v7x megacore) -------
    e_pad128 = _round_up(max(E, 1), 128)
    tile_e = min(_round_up(max(tile_e, 128), 128), e_pad128)
    if e_pad128 >= 256:
        tile_e = min(tile_e, _round_up((e_pad128 + 1) // 2, 128))

    # --- generation-gated VMEM budget + lane-padding-aware tile shrink -------
    try:
        vmem_cap = int(pltpu.get_tpu_info().vmem_capacity_bytes)
    except Exception:                       # conservative default = v7x (64 MiB)
        vmem_cap = 64 * 2**20
    vmem_budget = min((vmem_cap * 3) // 4, 100 * 2**20)   # ~96 MiB v5e/v6e, 48 MiB v7x
    while tile_e > 128 and _vmem_bytes(tile_e, N, C) + (2 << 20) > vmem_budget:
        tile_e = max(128, _round_up(tile_e // 2, 128))

    E_pad = _round_up(E, tile_e)
    num_tiles = E_pad // tile_e

    # pad only the tiny index array (never gathered feature arrays)
    idx = jnp.asarray(edge_index, jnp.int32)
    if E_pad != E:
        idx = jnp.pad(idx, ((0, 0), (0, E_pad - E)))

    kernel = functools.partial(_decoder_kernel, n_nodes=N, apply_sigmoid=sigmoid)

    cost = pl.CostEstimate(
        flops=int(E_pad * (4 * N * C + 4 * C)),
        transcendentals=int(E_pad if sigmoid else 0),
        bytes_accessed=int(idx.size * 4 + E_pad * 4 + 2 * C * N * 2 + 4 * C * 4),
    )

    out = pl.pallas_call(
        kernel,
        out_shape=jax.ShapeDtypeStruct((1, E_pad), jnp.float32),
        grid_spec=pltpu.PrefetchScalarGridSpec(
            num_scalar_prefetch=0,
            grid=(num_tiles,),
            in_specs=[
                pl.BlockSpec((2, tile_e), lambda i: (0, i)),   # edge-id tile
                pl.BlockSpec((C, N), lambda i: (0, 0)),        # P (resident)
                pl.BlockSpec((C, N), lambda i: (0, 0)),        # Q (resident)
                pl.BlockSpec((C, 1), lambda i: (0, 0)),        # b1
                pl.BlockSpec((1, C), lambda i: (0, 0)),        # w2
                pl.BlockSpec((1, 1), lambda i: (0, 0)),        # b2
            ],
            out_specs=pl.BlockSpec((1, tile_e), lambda i: (0, i)),
        ),
        compiler_params=pltpu.CompilerParams(
            dimension_semantics=("parallel",),
            vmem_limit_bytes=int(vmem_budget)),
        cost_estimate=cost,
    )(idx, pt, qt, b1c, w2r, b2r)

    out_flat = out.reshape(E_pad)[:E]     # drop edge padding
    if sigmoid:
        return jnp.squeeze(out_flat)      # torch .squeeze() -> [E] (scalar if E==1)
    return out_flat.reshape(E, 1)         # [E, 1]


def init_decoder_params(key, in_channels):
    """Deterministic init matching torch.nn.Linear shapes (weight: [out, in])."""
    k1, k2, k3, k4 = jax.random.split(key, 4)
    c = in_channels
    bound1 = 1.0 / jnp.sqrt(2.0 * c)
    bound2 = 1.0 / jnp.sqrt(1.0 * c)
    w1 = jax.random.uniform(k1, (c, 2 * c), jnp.float32, -bound1, bound1)
    b1 = jax.random.uniform(k2, (c,), jnp.float32, -bound1, bound1)
    w2 = jax.random.uniform(k3, (1, c), jnp.float32, -bound2, bound2)
    b2 = jax.random.uniform(k4, (1,), jnp.float32, -bound2, bound2)
    return (w1, b1, w2, b2)


def _reference(x, edge_index, params, sigmoid=True):
    w1, b1, w2, b2 = params
    xe = jnp.concatenate([x[edge_index[0]], x[edge_index[1]]], axis=1)
    h = jnp.maximum(xe @ w1.T + b1, 0.0)
    y = h @ w2.T + b2
    if sigmoid:
        return jnp.squeeze(jax.nn.sigmoid(y))
    return y


if __name__ == "__main__":
    key = jax.random.PRNGKey(0)
    kx, ke, kp = jax.random.split(key, 3)

    in_channels = 32
    num_nodes = 64
    num_edges = 300           # not a tile multiple -> exercises edge padding

    x = jax.random.normal(kx, (num_nodes, in_channels), jnp.float32)
    edge_index = jax.random.randint(ke, (2, num_edges), 0, num_nodes,
                                    dtype=jnp.int32)
    params = init_decoder_params(kp, in_channels)

    # multi-tile sigmoid path (tile_e=128 -> 3 grid steps)
    out = decoder_forward(x, edge_index, params, sigmoid=True, tile_e=128)
    out = jax.block_until_ready(out)
    ref = _reference(x, edge_index, params, sigmoid=True)
    assert out.shape == (num_edges,)
    assert jnp.allclose(out, ref, atol=3e-2, rtol=3e-2)   # bf16 P/Q, f32 accum

    # default-tile logits path (sigmoid=False) -> [E, 1]
    out2 = decoder_forward(x, edge_index, params, sigmoid=False)
    out2 = jax.block_until_ready(out2)
    ref2 = _reference(x, edge_index, params, sigmoid=False)
    assert out2.shape == (num_edges, 1)
    assert jnp.allclose(out2, ref2, atol=3e-2, rtol=3e-2)

    print("KERNEL_OK")
</pallas_src>

<mosaic_0001>
module attributes {stable_mosaic.version = 11 : i64} {
  func.func @_decoder_kernel(%arg0: i32, %arg1: memref<2x128xi32, #tpu.memory_space<vmem>>, %arg2: memref<32x64xbf16, #tpu.memory_space<vmem>>, %arg3: memref<32x64xbf16, #tpu.memory_space<vmem>>, %arg4: memref<32x1xf32, #tpu.memory_space<vmem>>, %arg5: memref<1x32xf32, #tpu.memory_space<vmem>>, %arg6: memref<1x1xf32, #tpu.memory_space<vmem>>, %arg7: memref<1x128xf32, #tpu.memory_space<vmem>>) attributes {dimension_semantics = [#tpu.dimension_semantics<parallel>], iteration_bounds = array<i64: 3>, scalar_prefetch = 0 : i64, scratch_operands = 0 : i64, tpu.core_type = #tpu.core_type<tc>, window_params = [{transform_indices = @transform_0, window_bounds = array<i64: 2, 128>}, {pipeline_mode = #tpu.pipeline_mode<synchronous>, transform_indices = @transform_1, window_bounds = array<i64: 32, 64>}, {pipeline_mode = #tpu.pipeline_mode<synchronous>, transform_indices = @transform_2, window_bounds = array<i64: 32, 64>}, {pipeline_mode = #tpu.pipeline_mode<synchronous>, transform_indices = @transform_3, window_bounds = array<i64: 32, 1>}, {pipeline_mode = #tpu.pipeline_mode<synchronous>, transform_indices = @transform_4, window_bounds = array<i64: 1, 32>}, {pipeline_mode = #tpu.pipeline_mode<synchronous>, transform_indices = @transform_5, window_bounds = array<i64: 1, 1>}, {transform_indices = @transform_6, window_bounds = array<i64: 1, 128>}]} {
    %c0 = arith.constant 0 : index
    %c0_0 = arith.constant 0 : index
    %0 = vector.load %arg1[%c0, %c0_0] : memref<2x128xi32, #tpu.memory_space<vmem>>, vector<2x128xi32>
    %1 = vector.extract_strided_slice %0 {offsets = [0, 0], sizes = [1, 128], strides = [1, 1]} : vector<2x128xi32> to vector<1x128xi32>
    %2 = vector.extract_strided_slice %0 {offsets = [1, 0], sizes = [1, 128], strides = [1, 1]} : vector<2x128xi32> to vector<1x128xi32>
    %3 = tpu.iota {dimensions = array<i32: 0>} : vector<64x128xi32>
    %4 = vector.broadcast %1 : vector<1x128xi32> to vector<64x128xi32>
    %5 = arith.cmpi eq, %3, %4 : vector<64x128xi32>
    %6 = arith.extui %5 : vector<64x128xi1> to vector<64x128xi32>
    %7 = arith.sitofp %6 : vector<64x128xi32> to vector<64x128xf32>
    %8 = arith.truncf %7 : vector<64x128xf32> to vector<64x128xbf16>
    %9 = vector.broadcast %2 : vector<1x128xi32> to vector<64x128xi32>
    %10 = arith.cmpi eq, %3, %9 : vector<64x128xi32>
    %11 = arith.extui %10 : vector<64x128xi1> to vector<64x128xi32>
    %12 = arith.sitofp %11 : vector<64x128xi32> to vector<64x128xf32>
    %13 = arith.truncf %12 : vector<64x128xf32> to vector<64x128xbf16>
    %c0_1 = arith.constant 0 : index
    %c0_2 = arith.constant 0 : index
    %14 = vector.load %arg2[%c0_1, %c0_2] : memref<32x64xbf16, #tpu.memory_space<vmem>>, vector<32x64xbf16>
    %cst = arith.constant dense<0.000000e+00> : vector<32x128xf32>
    %15 = tpu.matmul %14, %8, %cst {dimension_numbers = #tpu.dot_dimension_numbers<[1], [0], [0], [1], [0, 0, 1, 1], [], []>} : vector<32x64xbf16>, vector<64x128xbf16>, vector<32x128xf32> -> vector<32x128xf32>
    %c0_3 = arith.constant 0 : index
    %c0_4 = arith.constant 0 : index
    %16 = vector.load %arg3[%c0_3, %c0_4] : memref<32x64xbf16, #tpu.memory_space<vmem>>, vector<32x64xbf16>
    %cst_5 = arith.constant dense<0.000000e+00> : vector<32x128xf32>
    %17 = tpu.matmul %16, %13, %cst_5 {dimension_numbers = #tpu.dot_dimension_numbers<[1], [0], [0], [1], [0, 0, 1, 1], [], []>} : vector<32x64xbf16>, vector<64x128xbf16>, vector<32x128xf32> -> vector<32x128xf32>
    %18 = arith.addf %15, %17 : vector<32x128xf32>
    %c0_6 = arith.constant 0 : index
    %c0_7 = arith.constant 0 : index
    %19 = vector.load %arg4[%c0_6, %c0_7] : memref<32x1xf32, #tpu.memory_space<vmem>>, vector<32x1xf32>
    %20 = vector.broadcast %19 : vector<32x1xf32> to vector<32x128xf32>
    %21 = arith.addf %18, %20 : vector<32x128xf32>
    %cst_8 = arith.constant 0.000000e+00 : f32
    %22 = vector.broadcast %cst_8 : f32 to vector<32x128xf32>
    %23 = arith.maximumf %21, %22 : vector<32x128xf32>
    %c0_9 = arith.constant 0 : index
    %c0_10 = arith.constant 0 : index
    %24 = vector.load %arg5[%c0_9, %c0_10] : memref<1x32xf32, #tpu.memory_space<vmem>>, vector<1x32xf32>
    %cst_11 = arith.constant dense<0.000000e+00> : vector<1x128xf32>
    %25 = tpu.matmul %24, %23, %cst_11 {dimension_numbers = #tpu.dot_dimension_numbers<[1], [0], [0], [1], [0, 0, 1, 1], [], []>} : vector<1x32xf32>, vector<32x128xf32>, vector<1x128xf32> -> vector<1x128xf32>
    %c0_12 = arith.constant 0 : index
    %c0_13 = arith.constant 0 : index
    %26 = vector.load %arg6[%c0_12, %c0_13] : memref<1x1xf32, #tpu.memory_space<vmem>>, vector<1x1xf32>
    %27 = vector.broadcast %26 : vector<1x1xf32> to vector<1x128xf32>
    %28 = arith.addf %25, %27 : vector<1x128xf32>
    %29 = arith.negf %28 : vector<1x128xf32>
    %30 = math.exp %29 : vector<1x128xf32>
    %cst_14 = arith.constant 1.000000e+00 : f32
    %31 = vector.broadcast %cst_14 : f32 to vector<1x128xf32>
    %32 = arith.addf %31, %30 : vector<1x128xf32>
    %33 = arith.divf %31, %32 : vector<1x128xf32>
    %c0_15 = arith.constant 0 : index
    %c0_16 = arith.constant 0 : index
    %34 = vector.load %arg7[%c0_15, %c0_16] : memref<1x128xf32, #tpu.memory_space<vmem>>, vector<1x128xf32>
    tpu.vector_store %arg7[%c0_15, %c0_16], %33 {strides = array<i32>} : memref<1x128xf32, #tpu.memory_space<vmem>>, vector<1x128xf32>,
    return
  }
  func.func @transform_0(%arg0: i32) -> (i32, i32) {
    %c0_i32 = arith.constant 0 : i32
    %c0_i32_0 = arith.constant 0 : i32
    return %c0_i32, %arg0 : i32, i32
  }
  func.func @transform_1(%arg0: i32) -> (i32, i32) {
    %c0_i32 = arith.constant 0 : i32
    %c0_i32_0 = arith.constant 0 : i32
    %c0_i32_1 = arith.constant 0 : i32
    return %c0_i32, %c0_i32_0 : i32, i32
  }
  func.func @transform_2(%arg0: i32) -> (i32, i32) {
    %c0_i32 = arith.constant 0 : i32
    %c0_i32_0 = arith.constant 0 : i32
    %c0_i32_1 = arith.constant 0 : i32
    return %c0_i32, %c0_i32_0 : i32, i32
  }
  func.func @transform_3(%arg0: i32) -> (i32, i32) {
    %c0_i32 = arith.constant 0 : i32
    %c0_i32_0 = arith.constant 0 : i32
    %c0_i32_1 = arith.constant 0 : i32
    return %c0_i32, %c0_i32_0 : i32, i32
  }
  func.func @transform_4(%arg0: i32) -> (i32, i32) {
    %c0_i32 = arith.constant 0 : i32
    %c0_i32_0 = arith.constant 0 : i32
    %c0_i32_1 = arith.constant 0 : i32
    return %c0_i32, %c0_i32_0 : i32, i32
  }
  func.func @transform_5(%arg0: i32) -> (i32, i32) {
    %c0_i32 = arith.constant 0 : i32
    %c0_i32_0 = arith.constant 0 : i32
    %c0_i32_1 = arith.constant 0 : i32
    return %c0_i32, %c0_i32_0 : i32, i32
  }
  func.func @transform_6(%arg0: i32) -> (i32, i32) {
    %c0_i32 = arith.constant 0 : i32
    %c0_i32_0 = arith.constant 0 : i32
    return %c0_i32, %arg0 : i32, i32
  }
}

</mosaic_0001>

<bundles_post_ra>
// kernel: tpu_custom_call.1
= control target key start
LH: loop header
LB: loop body
LE: loop exit
PB: predicated region body
PF: predicated region fallthrough
CT: control target
= control target key end

     0   :  { %s1231_s0 = inlined_call_operand.hbm [shape: s32[2,384], index: 0, kind: input, shape index: {}]   ;;  %s1232_s1 = inlined_call_operand.vmem [shape: bf16[32,64], index: 1, kind: input, shape index: {}]   ;;  %s1233_s2 = inlined_call_operand.vmem [shape: bf16[32,64], index: 2, kind: input, shape index: {}]   ;;  %s1234_s3 = inlined_call_operand.vmem [shape: f32[32,1], index: 3, kind: input, shape index: {}]   ;;  %s1235_s4 = inlined_call_operand.vmem [shape: f32[1,32], index: 4, kind: input, shape index: {}]   ;;  %s1236_s5 = inlined_call_operand.<no memory space> [shape: f32[1,1], index: 5, kind: input, shape index: {}]   ;;  %s1237_s6 = inlined_call_operand.hbm [shape: f32[1,384], index: 6, kind: output, shape index: {}]  }
   0x1   :  { %v11_v0 = vstv %s1236_s5 }
   0x2   :  { %12 = vst [vmem:[#allocation2] sm:$0x1] %v11_v0 }
   0x3   :  { %13 = vsyncpa [#allocation4], 0 }
   0x4   :  { %15 = vsyncpa [#allocation4 + $0x1], 0 }
   0x5   :  { %16 = vsyncpa [#allocation5], 0 }
   0x6   :  { %18 = vsyncpa [#allocation5 + $0x1], 0  ;;  %s1003_s23 = smov 0   ;;  %s1005_s24 = smov 0  }
   0x7   :  { %s1007_s25 = smov 0   ;;  %s1009_s26 = smov 0  }
   0x8 LB: > { %s1024_s5 = sadd.s32 4294967295, %s956_s26   ;;  %s685_s27 = sadd.s32 4294967294, %s956_s26   ;;  %s956_s26 = sphi %s1009_s26, %s1255_s26   ;;  %s952_s25 = sphi %s1007_s25, %s1254_s25   ;;  %s948_s24 = sphi %s1005_s24, %s1253_s24   ;;  %s944_s23 = sphi %s1003_s23, %s1252_s23  }
   0x9   : > { %s1028_s28 = sadd.s32 1, %s956_s26   ;;  %s31_s29 = sadd.s32 1, %s952_s25 }
   0xa   : > { %s28_s30 = ssub.s32 %s956_s26, %s1028_s28  ;;  %p38_p0 = scmp.ne.s32.totalorder %s952_s25, %s948_s24 }
   0xb   : > { %p29_p1 = scmp.eq.s32.totalorder %s28_s30, 0  ;;  %p39_p2 = scmp.eq.s32.totalorder %s956_s26, 0 }
   0xc   : > { %p44_p3 = scmp.ne.s32.totalorder %s948_s24, %s944_s23  ;;  %p45_p4 = scmp.eq.s32.totalorder %s1024_s5, 0 }
   0xd   : > { %s1040_s7 = scalar_select %p29_p1, %s952_s25, %s31_s29  }
   0xe   : > { %p1042_p5 = por %p39_p2, %p38_p0  ;;  %p1046_p6 = por %p45_p4, %p44_p3 }
   0xf   : > { %p173_p7 = scmp.eq.s32.totalorder %s1024_s5, 2  ;;  %p179_p8 = scmp.eq.s32.totalorder %s685_s27, 2 }
  0x10   : > { %p811_p9 = scmp.lt.s32.totalorder %s956_s26, 3  ;;  %s214_s12 = sand.u32 1, %s952_s25  }
  0x11   : > { %p1052_p10 = por %p173_p7, %p38_p0  ;;  %p1056_p11 = por %p179_p8, %p44_p3 }
  0x12   : > { %s689_s13 = sshll.u32 %s956_s26, 5  ;;  %s688_s14 = sshll.u32 %s214_s12, 1 }
  0x13   : > { %s1241_s10 = scalar_select %p1052_p10, 1, 0 }
  0x14   : > { %s1242_s11 = scalar_select %p1056_p11, 1, 0 }
  0x15   : > { %s1065_s17 = scalar_lea.hbm %s1231_s0, %s689_s13  ;;  %s218_s18 = scalar_lea.vmem [#allocation3], %s688_s14 }
  0x16   : > { %s225_s19 = sshll.u32 %s218_s18, 4  ;;  %p1069_p12 = pnand %p811_p9, %p1042_p5  ;;  %s1073_s19 = int_to_ptr.vmem [resolvable:$true] %s225_s19 }
  0x17   : > { %s215_s21 = scalar_lea.sflag [#allocation4], %s214_s12  ;;  %s860_s22 = scalar_lea.hbm %s1065_s17, 32 }
  0x18   : > { %p861_p1 = scmp.ne.s32.totalorder %s1065_s17, %s860_s22  ;;  %p862_p2 = pneg %p1069_p12 }
  0x19   : > { %s865_s30 = scalar_lea.hbm %s1231_s0, 96  ;;  %p866_p5 = scmp.lt.u32.totalorder %s1065_s17, %s1231_s0 }
  0x1a   : > { %p863_p3 = pnand %p862_p2, %p861_p1  ;;  %p867_p7 = scmp.lt.u32.totalorder %s865_s30, %s860_s22 }
  0x1b   : > { %p869_p9 = scmp.lt.u32.totalorder %s860_s22, %s1065_s17 }
  0x1c   : > { %p864_p4 = pneg %p863_p3  ;;  %p868_p8 = por %p867_p7, %p866_p5 }
  0x1e   : > { %p870_p13 = por %p869_p9, %p868_p8 }
  0x20   : > { %p871_p0 = pnand %p870_p13, %p864_p4 }
  0x22   : > { %874 = shalt.err (!%p871_p0)
}
  0x23   : > { %s875_s12 = scalar_lea.vmem %s1073_s19, 32  ;;  %s958_s14 = smov [#allocation3]  }
  0x24   : > { %p876_p1 = scmp.ne.s32.totalorder %s1073_s19, %s875_s12  ;;  %s880_s15 = sshll.u32 %s958_s14, 4  ;;  %s881_s15 = int_to_ptr.vmem [resolvable:$false] %s880_s15 }
  0x25   : > { %s882_s16 = scalar_lea.vmem %s881_s15, 64  ;;  %p883_p10 = scmp.lt.s32.totalorder %s1073_s19, %s881_s15 }
  0x26   : > { %p878_p3 = pnand %p876_p1, %p862_p2  ;;  %p884_p5 = scmp.lt.s32.totalorder %s882_s16, %s875_s12 }
  0x28   : > { %p879_p11 = pneg %p878_p3  ;;  %p885_p7 = por %p884_p5, %p883_p10 }
  0x2a   : > { %p886_p8 = pnand %p885_p7, %p879_p11 }
  0x2c   : > { %889 = shalt.err (!%p886_p8)
}
  0x2d   : > { %806 = dma.hbm_to_vmem [thread:$0]  (!%p1069_p12), %s1065_s17, 32, %s1073_s19, %s215_s21  }
  0x2e   : > { %p1244_p13 = scmp.lt.s32.totalorder %s956_s26, 4  ;;  %p1245_p0 = scmp.ge.s32.totalorder %s956_s26, 1 }
  0x30   : > { %p231_p2 = pnand %p1245_p0, %p1244_p13 }
  0x31   : > { %s1107_s18 = sand.u32 (!%p231_p2), 1, %s948_s24  }
  0x32   : > { %234 = sbr.rel (%p231_p2) target bundleno = 569 (0x239), region = 44  ;;  %s691_s22 = sshll.u32 (!%p231_p2), %s1107_s18, 1 }
  0x33   : > { %s237_s27 = scalar_lea.sflag (!%p231_p2), [#allocation4], %s1107_s18  ;;  %s240_s29 = scalar_lea.vmem (!%p231_p2), [#allocation3], %s691_s22 }
  0x39   : > { %935 = dma.done.wait (%p1046_p6), %s237_s27, 32  }
  0x3a   : > { %937 = vsyncadd (%p1046_p6), %s237_s27, 4294967264  ;;  %v270_v1 = vlaneseq  ;;  %v959_v2 = vmov 0   ;;  %vm361_vm0 = vcmask 523264   ;;  %v269_v10 = vld [vmem:[%s240_s29] sm:$0x3]  ;;  %v484_v20 = vld [vmem:[%s1234_s3 + $0x10] sm:$0xff] }
  0x3b   : > { %850 = vset.pattern.permute.xlu0 %v959_v2  ;;  %851 = vset.pattern.permute.xlu1 %v959_v2  ;;  %v852_v14 = vld [vmem:[%s1233_s2] sm:$0xff]   ;;  %v960_v16 = vmov 1.0|1.0   ;;  %v483_v23 = vld [vmem:[%s1234_s3 + $0x8] sm:$0xff]  ;;  %v485_v24 = vld [vmem:[%s1234_s3 + $0x18] sm:$0xff]  ;;  %v961_v28 = vmov 0.0|0.0  }
  0x3c   : > { %v1115_v3 = vshrl.u32 %v270_v1, 7  ;;  %v853_v15 = vld [vmem:[%s1232_s1] sm:$0xff]   ;;  %762 = vmatprep.mubr.msk.bf16.mxu1 %vm361_vm0, %v852_v14  ;;  %498 = vperm.xlu1 %851, %v484_v20   ;;  %v854_v26 = vld [vmem:[%s1233_s2 + $0x8] sm:$0xff]   ;;  %v963_v29 = vmov 0.0   ;;  %s734_s20 = sshll.u32 %s1024_s5, 4  ;;  %s267_s21 = scalar_lea.vmem [#allocation6], %s1107_s18 }
  0x3d   : > { %774 = vmatprep.mubr.msk.bf16.mxu0 %vm361_vm0, %v853_v15  ;;  %v482_v19 = vld [vmem:[%s1234_s3] sm:$0xff]  ;;  %v855_v27 = vld [vmem:[%s1232_s1 + $0x8] sm:$0xff]   ;;  %s619_s30 = sshll.u32 %s267_s21, 4  ;;  %s1188_s12 = scalar_lea.hbm %s1237_s6, %s734_s20  ;;  %s1190_s30 = int_to_ptr.vmem [resolvable:$true] %s619_s30 }
  0x3e   : > { %v313_v4 = vsub.s32 1, %v1115_v3  ;;  %v281_v5 = vsub.s32 0, %v1115_v3  ;;  %v272_v6 = vadd.s32 8, %v1115_v3  ;;  %v273_v7 = vadd.s32 16, %v1115_v3  ;;  %488 = vperm.xlu0 %850, %v482_v19   ;;  %v515_v25 = vld [vmem:[#allocation2] sm:$0x1] }
  0x3f   : > { %v274_v8 = vadd.s32 24, %v1115_v3  ;;  %v275_v9 = vadd.s32 32, %v1115_v3  ;;  %v276_v13 = vadd.s32 40, %v1115_v3  ;;  %v277_v17 = vadd.s32 48, %v1115_v3  ;;  %v514_v56 = vld [vmem:[%s1235_s4] sm:$0x1] }
  0x40   : > { %v314_v11 = vrot.slane %v269_v10, %v313_v4  ;;  %v282_v12 = vrot.slane %v269_v10, %v281_v5  ;;  %v278_v18 = vadd.s32 56, %v1115_v3  ;;  %503 = vperm.xlu1 %851, %v485_v24   ;;  %s607_s14 = scalar_lea.sflag [#allocation5], %s1107_s18  ;;  %s890_s15 = scalar_lea.vmem %s1190_s30, 16 }
  0x41   : > { %p891_p6 = scmp.ne.s32.totalorder %s1190_s30, %s890_s15  ;;  %p1250_p10 = scmp.ne.s32.totalorder %s1241_s10, 0 }
  0x42   : > { %vm315_vm1 = vcmp.eq.s32.totalorder %v1115_v3, %v314_v11  ;;  %vm316_vm2 = vcmp.eq.s32.totalorder %v272_v6, %v314_v11  ;;  %vm283_vm3 = vcmp.eq.s32.totalorder %v1115_v3, %v282_v12  ;;  %vm284_vm4 = vcmp.eq.s32.totalorder %v272_v6, %v282_v12  ;;  %493 = vperm.xlu0 %850, %v483_v23   ;;  %s964_s5 = smov [#allocation6]  }
  0x43   : > { %vm710_vm5 = vmpackc.low %vm316_vm2, %vm315_vm1  ;;  %vm317_vm6 = vcmp.eq.s32.totalorder %v273_v7, %v314_v11  ;;  %vm318_vm7 = vcmp.eq.s32.totalorder %v274_v8, %v314_v11  ;;  %vm285_vm8 = vcmp.eq.s32.totalorder %v273_v7, %v282_v12  ;;  %vm286_vm9 = vcmp.eq.s32.totalorder %v274_v8, %v282_v12  ;;  %p892_p11 = pnand %p891_p6, %p1250_p10  ;;  %s894_s16 = sshll.u32 %s964_s5, 4  ;;  %s895_s16 = int_to_ptr.vmem [resolvable:$false] %s894_s16 }
  0x44   : > { %754 = vmatprep.subr.msk.bf16.mxu1 %vm710_vm5, %v960_v16  ;;  %vm722_vm10 = vmpackc.low %vm284_vm4, %vm283_vm3  ;;  %vm319_vm11 = vcmp.eq.s32.totalorder %v275_v9, %v314_v11  ;;  %vm320_vm12 = vcmp.eq.s32.totalorder %v276_v13, %v314_v11  ;;  %vm287_vm14 = vcmp.eq.s32.totalorder %v275_v9, %v282_v12  ;;  %vm288_vm15 = vcmp.eq.s32.totalorder %v276_v13, %v282_v12  ;;  %s896_s22 = scalar_lea.vmem %s895_s16, 32  ;;  %p897_p4 = scmp.lt.s32.totalorder %s1190_s30, %s895_s16 }
  0x45   : > { %766 = vmatprep.subr.msk.bf16.mxu0 %vm722_vm10, %v960_v16  ;;  %755 = vmatpush3.bf16.msk.msra.mxu1 %vm710_vm5, %v960_v16  ;;  %vm712_vm13 = vmpackc.low %vm318_vm7, %vm317_vm6  ;;  %vm321_vm4 = vcmp.eq.s32.totalorder %v277_v17, %v314_v11  ;;  %vm322_vm5 = vcmp.eq.s32.totalorder %v278_v18, %v314_v11  ;;  %vm289_vm6 = vcmp.eq.s32.totalorder %v277_v17, %v282_v12  ;;  %p893_p12 = pneg %p892_p11  ;;  %p898_p9 = scmp.lt.s32.totalorder %s896_s22, %s890_s15 }
  0x46   : > { %767 = vmatpush3.bf16.msk.msra.mxu0 %vm722_vm10, %v960_v16  ;;  %756 = vmatprep.subr.msk.bf16.mxu1 %vm712_vm13, %v960_v16  ;;  %vm724_vm1 = vmpackc.low %vm286_vm9, %vm285_vm8  ;;  %vm290_vm7 = vcmp.eq.s32.totalorder %v278_v18, %v282_v12  ;;  %vm962_vm10 = vmmov 0  }
  0x47   : > { %768 = vmatprep.subr.msk.bf16.mxu0 %vm724_vm1, %v960_v16  ;;  %vm1148_vm2 = vmpackc.low %vm320_vm12, %vm319_vm11  ;;  %518 = vperm.xlu0 %850, %v515_v25   ;;  %p899_p1 = por %p898_p9, %p897_p4 }
  0x48   : > { %vm1152_vm3 = vmpackc.low %vm288_vm15, %vm287_vm14 }
  0x49   : > { %757 = vmatpush3.bf16.msk.msra.mxu1 %vm712_vm13, %v960_v16  ;;  %vm716_vm8 = vmpackc.low %vm322_vm5, %vm321_vm4  ;;  %p900_p3 = pnand %p899_p1, %p893_p12 }
  0x4a   : > { %769 = vmatpush3.bf16.msk.msra.mxu0 %vm724_vm1, %v960_v16  ;;  %758 = vmatprep.subr.msk.bf16.mxu1 %vm1148_vm2, %v960_v16  ;;  %vm728_vm9 = vmpackc.low %vm290_vm7, %vm289_vm6 }
  0x4b   : > { %770 = vmatprep.subr.msk.bf16.mxu0 %vm1152_vm3, %v960_v16 }
  0x4d   : > { %759 = vmatpush3.bf16.msk.msra.mxu1 %vm1148_vm2, %v960_v16 }
  0x4e   : > { %771 = vmatpush3.bf16.msk.msra.mxu0 %vm1152_vm3, %v960_v16  ;;  %760 = vmatprep.subr.msk.bf16.mxu1 %vm716_vm8, %v960_v16 }
  0x4f   : > { %772 = vmatprep.subr.msk.bf16.mxu0 %vm728_vm9, %v960_v16 }
  0x51   : > { %761 = vmatpush3.bf16.msk.msra.mxu1 %vm716_vm8, %v960_v16 }
  0x52   : > { %773 = vmatpush3.bf16.msk.msra.mxu0 %vm728_vm9, %v960_v16  ;;  %789 = vmatprep.subr.bf16.mxu1 %v961_v28 }
  0x54   : > { %763 = vmatmul.mubr.msk.bf16.vlgmr.msra.gmra.mrb[0].mxu1 %vm361_vm0, %v854_v26 }
  0x55   : > { %775 = vmatmul.mubr.msk.bf16.vlgmr.msra.gmra.mrb[0].mxu0 %vm361_vm0, %v855_v27  ;;  %786 = vmatprep.mubr.msk.f32.mxu1 %vm962_vm10, %v963_v29  ;;  %vm525_vm0 = vcmask 261120  }
  0xbb   : > { %v499_v30 = vpop.permute.xlu1 %498 }
  0xbd   : > { %v489_v31 = vpop.permute.xlu0 %488 }
  0xbf   : > { %v504_v33 = vpop.permute.xlu1 %503 }
  0xc1   : > { %v494_v47 = vpop.permute.xlu0 %493 }
  0xc6   : > { %v519_v57 = vpop.permute.xlu0 %518 }
  0xc7   : > { %v524_v58 = vrot.slane %v519_v57, %v281_v5 }
 0x127   : > { %v764_v32 = vpop.f32.mrb[0].mxu1 }
 0x128   : > { %v776_v34 = vpop.f32.mrb[0].mxu0  ;;  %v402_v35 = vpop.f32.mrb[1].mxu1 }
 0x129   : > { %v476_v36 = vadd.f32 %v776_v34, %v764_v32  ;;  %v467_v37 = vpop.f32.mrb[1].mxu0  ;;  %v765_v38 = vpop.f32.mrb[2].mxu1 }
 0x12a   : > { %v468_v39 = vadd.f32 %v467_v37, %v402_v35  ;;  %v777_v40 = vpop.f32.mrb[2].mxu0  ;;  %v405_v41 = vpop.f32.mrb[3].mxu1 }
 0x12b   : > { %v508_v42 = vadd.f32 %v499_v30, %v476_v36  ;;  %v479_v43 = vadd.f32 %v777_v40, %v765_v38  ;;  %v470_v44 = vpop.f32.mrb[3].mxu0 }
 0x12c   : > { %v506_v45 = vadd.f32 %v489_v31, %v468_v39  ;;  %v471_v46 = vadd.f32 %v470_v44, %v405_v41 }
 0x12d   : > { %v509_v48 = vadd.f32 %v504_v33, %v479_v43  ;;  %v512_v50 = vmax.f32 %v508_v42, 0.0 }
 0x12e   : > { %v507_v49 = vadd.f32 %v494_v47, %v471_v46  ;;  %v510_v52 = vmax.f32 %v506_v45, 0.0 }
 0x12f   : > { %v513_v51 = vmax.f32 %v509_v48, 0.0 }
 0x130   : > { %v511_v53 = vmax.f32 %v507_v49, 0.0 }
 0x131   : > { %v793_v54 = vpack.c.bf16 %v513_v51, %v512_v50 }
 0x132   : > { %v790_v55 = vpack.c.bf16 %v511_v53, %v510_v52 }
 0x134   : > { %791 = vmatpush3.bf16.msra.mxu1 %v790_v55 }
 0x135   : > { %792 = vmatprep.subr.bf16.mxu1 %v961_v28 }
 0x138   : > { %794 = vmatpush3.bf16.msra.mxu1 %v793_v54 }
 0x13b   : > { %787 = vmatmul.mubr.msk.f32.vlgmr.msra.gmra.mrb[4].mxu1 %vm525_vm0, %v514_v56 }
 0x20e   : > { %v595_v59 = vpop.f32.mrb[4].mxu1 }
 0x20f   : > { %v596_v60 = vadd.f32 %v595_v59, %v524_v58  ;;  %v788_v61 = vpop.f32.mrb[5].mxu1 }
 0x211   : > { %v733_v62 = vmul.f32 -1.442695, %v596_v60 }
 0x213   : > { %856 = vpow2.f32 %v733_v62 }
 0x21d   : > { %v857_v63 = vpop.eup %856 }
 0x21e   : > { %v602_v0 = vadd.f32 1.0, %v857_v63 }
 0x220   : > { %858 = vrcp.f32 %v602_v0 }
 0x22a   : > { %v859_v1 = vpop.eup %858 }
 0x22b   : > { %605 = vst [vmem:[%s267_s21] sm:$0x1] %v859_v1 }
 0x22c   : > { %903 = shalt.err (!%p900_p3)
}
 0x22d   : > { %s904_s18 = scalar_lea.hbm %s1188_s12, 16  ;;  %s908_s9 = scalar_lea.hbm %s1237_s6, 48 }
 0x22e   : > { %p905_p5 = scmp.ne.s32.totalorder %s1188_s12, %s904_s18  ;;  %p909_p13 = scmp.lt.u32.totalorder %s1188_s12, %s1237_s6 }
 0x22f   : > { %p910_p0 = scmp.lt.u32.totalorder %s908_s9, %s904_s18  ;;  %p912_p6 = scmp.lt.u32.totalorder %s904_s18, %s1188_s12 }
 0x230   : > { %p906_p7 = pnand %p905_p5, %p1250_p10 }
 0x231   : > { %p911_p2 = por %p910_p0, %p909_p13 }
 0x232   : > { %p907_p8 = pneg %p906_p7 }
 0x233   : > { %p913_p11 = por %p912_p6, %p911_p2 }
 0x235   : > { %p914_p12 = pnand %p913_p11, %p907_p8 }
 0x237   : > { %917 = shalt.err (!%p914_p12)
}
 0x238   : > { %801 = dma.vmem_to_hbm [thread:$0]  (%p1250_p10), %s1190_s30, 16, %s1188_s12, %s607_s14  }
 0x239 PF: > { %p812_p4 = scmp.ge.s32.totalorder %s956_s26, 2  ;;  %s631_s20 = sand.u32 1, %s944_s23  }
 0x23a   : > { %p1251_p9 = scmp.ne.s32.totalorder %s1242_s11, 0  ;;  %s632_s21 = scalar_lea.sflag [#allocation5], %s631_s20 }
 0x23c   : > { %p808_p1 = pnand %p812_p4, %p1251_p9 }
 0x23e   : > { %939 = dma.done.wait (!%p808_p1), %s632_s21, 16  }
 0x23f   : > { %941 = vsyncadd (!%p808_p1), %s632_s21, 4294967280  ;;  %p21_p3 = scmp.ge.s32.totalorder %s1028_s28, 5   ;;  %s1252_s23 = smov %s948_s24 }
 0x240   : > { %s1253_s24 = smov %s952_s25  ;;  %s1254_s25 = smov %s1040_s7 }
 0x241   : > { %s1255_s26 = smov %s1028_s28  ;;  %23 = sbr.rel (!%p21_p3) target bundleno = 8 (0x8), region = 89 }
 0x248   :  { %636 = vsyncpa [#allocation4], 1 }
 0x249   :  { %638 = vsyncpa [#allocation4 + $0x1], 1 }
 0x24a   :  { %639 = vsyncpa [#allocation5], 1 }
 0x24b   :  { %641 = vsyncpa [#allocation5 + $0x1], 1 }

</bundles_post_ra>
